<compile_context>
chip_gen: v7x
topology: tpu7x:2x2x1
jax: 0.10.0
libtpu: 0.0.40
codegen_flags: <defaults>
</compile_context>

<pallas_src>
import math
import functools

import jax
import jax.numpy as jnp
from jax.experimental import pallas as pl
from jax.experimental.pallas import tpu as pltpu

NEG_INF = -1e30  # finite "minus infinity" keeps the online-softmax NaN-free

# Older JAX releases expose the Mosaic params as TPUCompilerParams.
_CompilerParams = getattr(pltpu, "CompilerParams", None) or getattr(
    pltpu, "TPUCompilerParams")


def _layernorm(v, gamma, beta, eps=1e-5):
    mean = jnp.mean(v, axis=-1, keepdims=True)
    var = jnp.mean((v - mean) ** 2, axis=-1, keepdims=True)   # unbiased=False
    return gamma * ((v - mean) * jax.lax.rsqrt(var + eps)) + beta


def _gelu_tanh(x):
    c = math.sqrt(2.0 / math.pi)
    return 0.5 * x * (1.0 + jnp.tanh(c * (x + 0.044715 * x * x * x)))


def _split_heads(x2d, n_heads):
    # (t, E) -> (n_heads, t, head_dim); minor dim preserved by the transpose.
    t, e = x2d.shape
    return x2d.reshape(t, n_heads, e // n_heads).transpose(1, 0, 2)


# --------------------------------------------------------------------------
# Kernel 1: LN1 + Q/K/V projection (once per row tile, never in the kv loop).
# --------------------------------------------------------------------------
def qkv_proj_kernel(x_ref, g1_ref, s1_ref, wq_ref, wk_ref, wv_ref,
                    q_out, k_out, v_out, *, n_heads, scale):
    bf16 = jnp.bfloat16
    x = x_ref[0].astype(jnp.float32)                           # (tr, E)
    h = _layernorm(x, g1_ref[...], s1_ref[...]).astype(bf16)
    # 1/sqrt(hd) folded into Q here (O(T*E) multiplies, done in f32).
    q = jnp.dot(h, wq_ref[...], preferred_element_type=jnp.float32) * scale
    k = jnp.dot(h, wk_ref[...], preferred_element_type=jnp.float32)
    v = jnp.dot(h, wv_ref[...], preferred_element_type=jnp.float32)
    q_out[0] = _split_heads(q, n_heads).astype(q_out.dtype)    # (H, tr, hd) bf16
    k_out[0] = _split_heads(k, n_heads).astype(k_out.dtype)
    v_out[0] = _split_heads(v, n_heads).astype(v_out.dtype)


# --------------------------------------------------------------------------
# Kernel 2: flash-style causal attention + out-proj + residual -> x1.
# --------------------------------------------------------------------------
def flash_attn_kernel(x_ref, q_ref, k_ref, v_ref, wo_ref, bo_ref, o_ref,
                      m_scr, l_scr, acc_scr, *, tq, tkv):
    qi = pl.program_id(1)
    ki = pl.program_id(2)
    nkv = pl.num_programs(2)
    q_start = qi * tq
    k_start = ki * tkv
    bf16 = jnp.bfloat16

    @pl.when(ki == 0)
    def _init():
        m_scr[...] = jnp.full_like(m_scr, NEG_INF)
        l_scr[...] = jnp.zeros_like(l_scr)
        acc_scr[...] = jnp.zeros_like(acc_scr)

    def update(apply_mask):
        # Q pre-scaled bf16 from the prologue; head-batched MXU contraction,
        # f32 accumulation.
        s = jnp.einsum('hqd,hkd->hqk', q_ref[0], k_ref[0],
                       preferred_element_type=jnp.float32)      # (H, tq, tkv)
        if apply_mask:
            row = jax.lax.broadcasted_iota(jnp.int32, (tq, tkv), 0) + q_start
            col = jax.lax.broadcasted_iota(jnp.int32, (tq, tkv), 1) + k_start
            s = jnp.where((col <= row)[None, :, :], s, NEG_INF)
        m_new = jnp.maximum(m_scr[...], jnp.max(s, axis=-1, keepdims=True))
        alpha = jnp.exp(m_scr[...] - m_new)
        p = jnp.exp(s - m_new)
        l_scr[...] = alpha * l_scr[...] + jnp.sum(p, axis=-1, keepdims=True)
        acc_scr[...] = alpha * acc_scr[...] + jnp.einsum(
            'hqk,hkd->hqd', p.astype(bf16), v_ref[0],
            preferred_element_type=jnp.float32)
        m_scr[...] = m_new

    # Classify this kv block against the causal diagonal.
    has_valid = k_start <= q_start + tq - 1          # at least one unmasked col
    fully_below = k_start + tkv - 1 <= q_start       # no masking needed at all

    @pl.when(jnp.logical_and(has_valid, jnp.logical_not(fully_below)))
    def _straddles_diag():
        update(apply_mask=True)

    @pl.when(fully_below)
    def _below_diag():
        update(apply_mask=False)

    @pl.when(ki == nkv - 1)
    def _finalize():
        n_heads, _, hd = acc_scr.shape
        ctx = acc_scr[...] * pl.reciprocal(l_scr[...], approx=True)  # (H,tq,hd)
        ctx2d = ctx.transpose(1, 0, 2).reshape(tq, n_heads * hd)
        attn = jnp.dot(ctx2d.astype(bf16), wo_ref[...],
                       preferred_element_type=jnp.float32) + bo_ref[...]
        # residual; drop_shortcut = identity (eval mode)
        o_ref[0] = (x_ref[0].astype(jnp.float32) + attn).astype(o_ref.dtype)


# --------------------------------------------------------------------------
# Kernel 3: LN2 + FFN (tiled over the 4E hidden axis) + residual -> out.
# --------------------------------------------------------------------------
def ffn_kernel(x1_ref, g2_ref, s2_ref, w1_ref, b1_ref, w2_ref, b2_ref,
               o_ref, h2_scr, acc_scr):
    hi = pl.program_id(2)
    nh = pl.num_programs(2)

    @pl.when(hi == 0)
    def _init():
        x1 = x1_ref[0].astype(jnp.float32)
        h2_scr[...] = _layernorm(x1, g2_ref[...], s2_ref[...]).astype(h2_scr.dtype)
        acc_scr[...] = jnp.zeros_like(acc_scr)

    u = jnp.dot(h2_scr[...], w1_ref[...],
                preferred_element_type=jnp.float32) + b1_ref[...]   # (tr, th)
    u = _gelu_tanh(u)
    acc_scr[...] += jnp.dot(u.astype(jnp.bfloat16), w2_ref[...],
                            preferred_element_type=jnp.float32)

    @pl.when(hi == nh - 1)
    def _finalize():
        out = x1_ref[0].astype(jnp.float32) + acc_scr[...] + b2_ref[...]
        o_ref[0] = out.astype(o_ref.dtype)


# --------------------------------------------------------------------------
# Wrapper
# --------------------------------------------------------------------------
def transformer_block(x, params, n_heads, *,
                      q_block=256, kv_block=256, hidden_block=512):
    """LayerNorm->causal MHA->residual->LayerNorm->FFN->residual (eval mode).

    Tile guidance: v6e defaults (256/256) fill the 256-deep MXU and amortize
    the ~0.35 us/step grid overhead; on v5e pass kv_block=128 and keep
    q_block>=256; on v7x keep B*(T//q_block) >= 2 (ideally even) so both
    TensorCores get balanced work.
    """
    B, T, E = x.shape
    Hf = 4 * E
    assert E % n_heads == 0
    hd = E // n_heads
    out_dtype = x.dtype

    tq = min(q_block, T)
    tkv = min(kv_block, T)
    assert T % tq == 0 and T % tkv == 0
    nq, nkv = T // tq, T // tkv
    th = min(hidden_block, Hf)
    assert Hf % th == 0
    nh = Hf // th
    tr = tq                       # row tile for the prologue / FFN kernels

    (wq, wk, wv, wo, bo, g1, s1, g2, s2, w1, b1, w2, b2) = params
    bf16, f32 = jnp.bfloat16, jnp.float32
    # bf16 weights: full-rate MXU on all generations, half the DMA/VMEM bytes.
    wq, wk, wv, wo, w1, w2 = (w.astype(bf16) for w in (wq, wk, wv, wo, w1, w2))
    # biases / LN params stay f32 (VPU-side math; v5e has no bf16 VPU).
    bo, g1, s1, g2, s2, b1, b2 = (p.astype(f32)
                                  for p in (bo, g1, s1, g2, s2, b1, b2))
    x = x.astype(f32)

    def vmem_limit(working_set_bytes):
        # 2x margin for compiler-internal scratch / pipeline buffers, capped
        # below v7x's 64 MiB per-TC physical VMEM (harmless on 128 MiB parts).
        return int(min(56 * 1024 * 1024,
                       max(32 * 1024 * 1024, 2 * working_set_bytes)))

    # TODO(synk): at large E on v7x, mark the constant-index weight specs with
    # pipeline_mode=pl.Buffered(1) to drop their pointless double-buffering;
    # at these sizes the structural split already keeps resident weights small.

    # ---- Kernel 1: LN1 + QKV projection, head-split bf16 (B, H, T, hd) ----
    qkv_shape = jax.ShapeDtypeStruct((B, n_heads, T, hd), bf16)
    proj_ws = (2 * (tr * E * 4 + 3 * E * E * 2 + 2 * E * 4 + 3 * tr * E * 2)
               + 6 * tr * E * 4)
    q_hs, k_hs, v_hs = pl.pallas_call(
        functools.partial(qkv_proj_kernel, n_heads=n_heads,
                          scale=1.0 / math.sqrt(hd)),
        out_shape=(qkv_shape, qkv_shape, qkv_shape),
        grid_spec=pltpu.PrefetchScalarGridSpec(
            num_scalar_prefetch=0,
            grid=(B, T // tr),
            in_specs=[
                pl.BlockSpec((1, tr, E), lambda b, r: (b, r, 0)),   # x rows
                pl.BlockSpec((1, E), lambda b, r: (0, 0)),          # g1
                pl.BlockSpec((1, E), lambda b, r: (0, 0)),          # s1
                pl.BlockSpec((E, E), lambda b, r: (0, 0)),          # Wq
                pl.BlockSpec((E, E), lambda b, r: (0, 0)),          # Wk
                pl.BlockSpec((E, E), lambda b, r: (0, 0)),          # Wv
            ],
            out_specs=(
                pl.BlockSpec((1, n_heads, tr, hd), lambda b, r: (b, 0, r, 0)),
                pl.BlockSpec((1, n_heads, tr, hd), lambda b, r: (b, 0, r, 0)),
                pl.BlockSpec((1, n_heads, tr, hd), lambda b, r: (b, 0, r, 0)),
            ),
        ),
        compiler_params=_CompilerParams(
            dimension_semantics=("parallel", "parallel"),
            vmem_limit_bytes=vmem_limit(proj_ws)),
    )(x, g1, s1, wq, wk, wv)

    # ---- Kernel 2: flash attention + out-proj + residual -> x1 ----
    def last_kv_block(q):
        return (q * tq + tq - 1) // tkv

    # Causal DMA clamp: blocks above the diagonal map to the already-fetched
    # block (same block index => no new DMA); compute is skipped via pl.when.
    kv_spec = pl.BlockSpec(
        (1, n_heads, tkv, hd),
        lambda b, q, k: (b, 0, jnp.minimum(k, last_kv_block(q)), 0))

    flash_ws = (2 * (2 * tq * E * 4 + tq * E * 2 + 2 * tkv * E * 2
                     + E * E * 2 + E * 4)
                + (2 * n_heads * tq * 4 + tq * E * 4)
                + 4 * n_heads * tq * tkv * 4 + 4 * tq * E * 4)
    x1 = pl.pallas_call(
        functools.partial(flash_attn_kernel, tq=tq, tkv=tkv),
        out_shape=jax.ShapeDtypeStruct((B, T, E), f32),
        grid_spec=pltpu.PrefetchScalarGridSpec(
            num_scalar_prefetch=0,
            grid=(B, nq, nkv),
            in_specs=[
                pl.BlockSpec((1, tq, E), lambda b, q, k: (b, q, 0)),   # residual
                pl.BlockSpec((1, n_heads, tq, hd),
                             lambda b, q, k: (b, 0, q, 0)),            # Q
                kv_spec,                                               # K
                kv_spec,                                               # V
                pl.BlockSpec((E, E), lambda b, q, k: (0, 0)),          # Wo
                pl.BlockSpec((1, E), lambda b, q, k: (0, 0)),          # bo
            ],
            out_specs=pl.BlockSpec((1, tq, E), lambda b, q, k: (b, q, 0)),
            scratch_shapes=[
                pltpu.VMEM((n_heads, tq, 1), f32),     # running max
                pltpu.VMEM((n_heads, tq, 1), f32),     # running denominator
                pltpu.VMEM((n_heads, tq, hd), f32),    # context accumulator
            ],
        ),
        compiler_params=_CompilerParams(
            dimension_semantics=("parallel", "parallel", "arbitrary"),
            vmem_limit_bytes=vmem_limit(flash_ws)),
    )(x, q_hs, k_hs, v_hs, wo, bo)

    # ---- Kernel 3: LN2 + FFN (hidden-tiled) + residual -> out ----
    ffn_ws = (2 * (2 * tr * E * 4 + E * th * 2 + th * E * 2 + th * 4 + 3 * E * 4)
              + tr * E * 2 + tr * E * 4 + 3 * tr * th * 4)
    out = pl.pallas_call(
        ffn_kernel,
        out_shape=jax.ShapeDtypeStruct((B, T, E), out_dtype),
        grid_spec=pltpu.PrefetchScalarGridSpec(
            num_scalar_prefetch=0,
            grid=(B, T // tr, nh),
            in_specs=[
                pl.BlockSpec((1, tr, E), lambda b, r, h: (b, r, 0)),   # x1
                pl.BlockSpec((1, E), lambda b, r, h: (0, 0)),          # g2
                pl.BlockSpec((1, E), lambda b, r, h: (0, 0)),          # s2
                pl.BlockSpec((E, th), lambda b, r, h: (0, h)),         # W1 tile
                pl.BlockSpec((1, th), lambda b, r, h: (0, h)),         # b1 tile
                pl.BlockSpec((th, E), lambda b, r, h: (h, 0)),         # W2 tile
                pl.BlockSpec((1, E), lambda b, r, h: (0, 0)),          # b2
            ],
            out_specs=pl.BlockSpec((1, tr, E), lambda b, r, h: (b, r, 0)),
            scratch_shapes=[
                pltpu.VMEM((tr, E), bf16),   # cached LN2(x1), bf16 MXU operand
                pltpu.VMEM((tr, E), f32),    # hidden-axis accumulator
            ],
        ),
        compiler_params=_CompilerParams(
            dimension_semantics=("parallel", "parallel", "arbitrary"),
            vmem_limit_bytes=vmem_limit(ffn_ws)),
    )(x1, g2, s2, w1, b1, w2, b2)
    return out


# --------------------------------------------------------------------------
# Pure-JAX reference (mirrors the PyTorch module, eval mode).
# --------------------------------------------------------------------------
def reference_transformer_block(x, params, n_heads):
    (wq, wk, wv, wo, bo, g1, s1, g2, s2, w1, b1, w2, b2) = params
    B, T, E = x.shape
    Dh = E // n_heads

    def ln(v, g, s):
        mean = jnp.mean(v, axis=-1, keepdims=True)
        var = jnp.mean((v - mean) ** 2, axis=-1, keepdims=True)
        return g * ((v - mean) / jnp.sqrt(var + 1e-5)) + s

    h = ln(x, g1, s1)
    q = (h @ wq).reshape(B, T, n_heads, Dh).transpose(0, 2, 1, 3)
    k = (h @ wk).reshape(B, T, n_heads, Dh).transpose(0, 2, 1, 3)
    v = (h @ wv).reshape(B, T, n_heads, Dh).transpose(0, 2, 1, 3)
    sc = jnp.einsum('bhqd,bhkd->bhqk', q, k) / math.sqrt(Dh)
    mask = jnp.tril(jnp.ones((T, T), bool))
    sc = jnp.where(mask, sc, -jnp.inf)
    p = jax.nn.softmax(sc, axis=-1)
    ctx = jnp.einsum('bhqk,bhkd->bhqd', p, v).transpose(0, 2, 1, 3).reshape(B, T, E)
    x1 = x + (ctx @ wo + bo)
    h2 = ln(x1, g2, s2)
    ff = h2 @ w1 + b1
    ff = 0.5 * ff * (1 + jnp.tanh(jnp.sqrt(2.0 / jnp.pi) * (ff + 0.044715 * ff ** 3)))
    ff = ff @ w2 + b2
    return x1 + ff


if __name__ == "__main__":
    def run_case(B, T, E, n_heads, q_block, kv_block, seed):
        Hf = 4 * E
        key = jax.random.PRNGKey(seed)
        keys = jax.random.split(key, 10)
        f32 = jnp.float32
        init = lambda k, shape, s=0.05: (s * jax.random.normal(k, shape)).astype(f32)

        x = jax.random.normal(keys[0], (B, T, E), dtype=f32)
        wq = init(keys[1], (E, E)); wk = init(keys[2], (E, E))
        wv = init(keys[3], (E, E)); wo = init(keys[4], (E, E))
        bo = init(keys[5], (1, E))
        g1 = jnp.ones((1, E), f32); s1 = jnp.zeros((1, E), f32)
        g2 = jnp.ones((1, E), f32); s2 = jnp.zeros((1, E), f32)
        w1 = init(keys[6], (E, Hf)); b1 = init(keys[7], (1, Hf))
        w2 = init(keys[8], (Hf, E)); b2 = init(keys[9], (1, E))
        params = (wq, wk, wv, wo, bo, g1, s1, g2, s2, w1, b1, w2, b2)

        out = transformer_block(x, params, n_heads,
                                q_block=q_block, kv_block=kv_block)
        out = jax.block_until_ready(out)

        # Reference uses the same bf16-rounded matmul weights the kernel sees;
        # remaining diff is bf16 activation casts + approx reciprocal.
        rq = lambda w: w.astype(jnp.bfloat16).astype(f32)
        params_ref = (rq(wq), rq(wk), rq(wv), rq(wo), bo, g1, s1, g2, s2,
                      rq(w1), b1, rq(w2), b2)
        ref = reference_transformer_block(x, params_ref, n_heads)

        assert out.shape == (B, T, E)
        err = float(jnp.max(jnp.abs(out - ref)))
        assert jnp.allclose(out, ref, atol=2e-2, rtol=2e-2), f"mismatch {err}"

    # Toy GPT config: emb_dim=32, n_heads=4, context_length=8 (single tile).
    # NOTE: E=32 / hd=8 are inherently lane-sparse; real configs (E a multiple
    # of 128) fill the 128-lane vregs and avoid masked partial stores.
    run_case(B=2, T=8, E=32, n_heads=4, q_block=128, kv_block=128, seed=0)
    # Multi-tile path: exercises q/kv tiling, the causal DMA clamp, the
    # masked/unmasked block specialization, and the online-softmax carry.
    run_case(B=2, T=32, E=32, n_heads=4, q_block=8, kv_block=8, seed=1)

    print("KERNEL_OK")
</pallas_src>

<mosaic_0001>
module attributes {stable_mosaic.version = 11 : i64} {
  func.func @qkv_proj_kernel(%arg0: i32, %arg1: i32, %arg2: memref<1x8x32xf32, #tpu.memory_space<vmem>>, %arg3: memref<1x32xf32, #tpu.memory_space<vmem>>, %arg4: memref<1x32xf32, #tpu.memory_space<vmem>>, %arg5: memref<32x32xbf16, #tpu.memory_space<vmem>>, %arg6: memref<32x32xbf16, #tpu.memory_space<vmem>>, %arg7: memref<32x32xbf16, #tpu.memory_space<vmem>>, %arg8: memref<1x4x8x8xbf16, #tpu.memory_space<vmem>>, %arg9: memref<1x4x8x8xbf16, #tpu.memory_space<vmem>>, %arg10: memref<1x4x8x8xbf16, #tpu.memory_space<vmem>>) attributes {dimension_semantics = [#tpu.dimension_semantics<parallel>, #tpu.dimension_semantics<parallel>], iteration_bounds = array<i64: 2, 1>, scalar_prefetch = 0 : i64, scratch_operands = 0 : i64, tpu.core_type = #tpu.core_type<tc>, window_params = [{transform_indices = @transform_0, window_bounds = array<i64: 1, 8, 32>}, {pipeline_mode = #tpu.pipeline_mode<synchronous>, transform_indices = @transform_1, window_bounds = array<i64: 1, 32>}, {pipeline_mode = #tpu.pipeline_mode<synchronous>, transform_indices = @transform_2, window_bounds = array<i64: 1, 32>}, {pipeline_mode = #tpu.pipeline_mode<synchronous>, transform_indices = @transform_3, window_bounds = array<i64: 32, 32>}, {pipeline_mode = #tpu.pipeline_mode<synchronous>, transform_indices = @transform_4, window_bounds = array<i64: 32, 32>}, {pipeline_mode = #tpu.pipeline_mode<synchronous>, transform_indices = @transform_5, window_bounds = array<i64: 32, 32>}, {transform_indices = @transform_6, window_bounds = array<i64: 1, 4, 8, 8>}, {transform_indices = @transform_7, window_bounds = array<i64: 1, 4, 8, 8>}, {transform_indices = @transform_8, window_bounds = array<i64: 1, 4, 8, 8>}]} {
    %c0 = arith.constant 0 : index
    %c0_0 = arith.constant 0 : index
    %c0_1 = arith.constant 0 : index
    %0 = vector.load %arg2[%c0, %c0_0, %c0_1] : memref<1x8x32xf32, #tpu.memory_space<vmem>>, vector<1x8x32xf32>
    %1 = vector.shape_cast %0 : vector<1x8x32xf32> to vector<8x32xf32>
    %c0_2 = arith.constant 0 : index
    %c0_3 = arith.constant 0 : index
    %2 = vector.load %arg3[%c0_2, %c0_3] : memref<1x32xf32, #tpu.memory_space<vmem>>, vector<1x32xf32>
    %c0_4 = arith.constant 0 : index
    %c0_5 = arith.constant 0 : index
    %3 = vector.load %arg4[%c0_4, %c0_5] : memref<1x32xf32, #tpu.memory_space<vmem>>, vector<1x32xf32>
    %cst = arith.constant dense<0.000000e+00> : vector<8xf32>
    %4 = vector.multi_reduction <add>, %1, %cst [1] : vector<8x32xf32> to vector<8xf32>
    %5 = vector.shape_cast %4 : vector<8xf32> to vector<8x1xf32>
    %cst_6 = arith.constant 3.200000e+01 : f32
    %6 = vector.broadcast %cst_6 : f32 to vector<8x1xf32>
    %7 = arith.divf %5, %6 : vector<8x1xf32>
    %8 = vector.broadcast %7 : vector<8x1xf32> to vector<8x32xf32>
    %9 = arith.subf %1, %8 : vector<8x32xf32>
    %10 = arith.mulf %9, %9 : vector<8x32xf32>
    %cst_7 = arith.constant dense<0.000000e+00> : vector<8xf32>
    %11 = vector.multi_reduction <add>, %10, %cst_7 [1] : vector<8x32xf32> to vector<8xf32>
    %12 = vector.shape_cast %11 : vector<8xf32> to vector<8x1xf32>
    %cst_8 = arith.constant 3.200000e+01 : f32
    %13 = vector.broadcast %cst_8 : f32 to vector<8x1xf32>
    %14 = arith.divf %12, %13 : vector<8x1xf32>
    %15 = vector.broadcast %7 : vector<8x1xf32> to vector<8x32xf32>
    %16 = arith.subf %1, %15 : vector<8x32xf32>
    %cst_9 = arith.constant 9.99999974E-6 : f32
    %17 = vector.broadcast %cst_9 : f32 to vector<8x1xf32>
    %18 = arith.addf %14, %17 : vector<8x1xf32>
    %19 = math.rsqrt %18 : vector<8x1xf32>
    %20 = vector.broadcast %19 : vector<8x1xf32> to vector<8x32xf32>
    %21 = arith.mulf %16, %20 : vector<8x32xf32>
    %22 = vector.broadcast %2 : vector<1x32xf32> to vector<8x32xf32>
    %23 = arith.mulf %22, %21 : vector<8x32xf32>
    %24 = vector.broadcast %3 : vector<1x32xf32> to vector<8x32xf32>
    %25 = arith.addf %23, %24 : vector<8x32xf32>
    %26 = arith.truncf %25 : vector<8x32xf32> to vector<8x32xbf16>
    %c0_10 = arith.constant 0 : index
    %c0_11 = arith.constant 0 : index
    %27 = vector.load %arg5[%c0_10, %c0_11] : memref<32x32xbf16, #tpu.memory_space<vmem>>, vector<32x32xbf16>
    %cst_12 = arith.constant dense<0.000000e+00> : vector<8x32xf32>
    %28 = tpu.matmul %26, %27, %cst_12 {dimension_numbers = #tpu.dot_dimension_numbers<[1], [0], [0], [1], [0, 0, 1, 1], [], []>} : vector<8x32xbf16>, vector<32x32xbf16>, vector<8x32xf32> -> vector<8x32xf32>
    %cst_13 = arith.constant 0.353553385 : f32
    %29 = vector.broadcast %cst_13 : f32 to vector<8x32xf32>
    %30 = arith.mulf %28, %29 : vector<8x32xf32>
    %c0_14 = arith.constant 0 : index
    %c0_15 = arith.constant 0 : index
    %31 = vector.load %arg6[%c0_14, %c0_15] : memref<32x32xbf16, #tpu.memory_space<vmem>>, vector<32x32xbf16>
    %cst_16 = arith.constant dense<0.000000e+00> : vector<8x32xf32>
    %32 = tpu.matmul %26, %31, %cst_16 {dimension_numbers = #tpu.dot_dimension_numbers<[1], [0], [0], [1], [0, 0, 1, 1], [], []>} : vector<8x32xbf16>, vector<32x32xbf16>, vector<8x32xf32> -> vector<8x32xf32>
    %c0_17 = arith.constant 0 : index
    %c0_18 = arith.constant 0 : index
    %33 = vector.load %arg7[%c0_17, %c0_18] : memref<32x32xbf16, #tpu.memory_space<vmem>>, vector<32x32xbf16>
    %cst_19 = arith.constant dense<0.000000e+00> : vector<8x32xf32>
    %34 = tpu.matmul %26, %33, %cst_19 {dimension_numbers = #tpu.dot_dimension_numbers<[1], [0], [0], [1], [0, 0, 1, 1], [], []>} : vector<8x32xbf16>, vector<32x32xbf16>, vector<8x32xf32> -> vector<8x32xf32>
    %35 = vector.shape_cast %30 : vector<8x32xf32> to vector<8x4x8xf32>
    %36 = tpu.transpose %35, [1, 0, 2] : vector<8x4x8xf32> -> vector<4x8x8xf32>
    %37 = arith.truncf %36 : vector<4x8x8xf32> to vector<4x8x8xbf16>
    %c0_20 = arith.constant 0 : index
    %c0_21 = arith.constant 0 : index
    %c0_22 = arith.constant 0 : index
    %c0_23 = arith.constant 0 : index
    %38 = vector.load %arg8[%c0_20, %c0_21, %c0_22, %c0_23] : memref<1x4x8x8xbf16, #tpu.memory_space<vmem>>, vector<1x4x8x8xbf16>
    %39 = vector.shape_cast %38 : vector<1x4x8x8xbf16> to vector<4x8x8xbf16>
    %40 = vector.shape_cast %37 : vector<4x8x8xbf16> to vector<1x4x8x8xbf16>
    tpu.vector_store %arg8[%c0_20, %c0_21, %c0_22, %c0_23], %40 {strides = array<i32>} : memref<1x4x8x8xbf16, #tpu.memory_space<vmem>>, vector<1x4x8x8xbf16>,
    %41 = vector.shape_cast %32 : vector<8x32xf32> to vector<8x4x8xf32>
    %42 = tpu.transpose %41, [1, 0, 2] : vector<8x4x8xf32> -> vector<4x8x8xf32>
    %43 = arith.truncf %42 : vector<4x8x8xf32> to vector<4x8x8xbf16>
    %c0_24 = arith.constant 0 : index
    %c0_25 = arith.constant 0 : index
    %c0_26 = arith.constant 0 : index
    %c0_27 = arith.constant 0 : index
    %44 = vector.load %arg9[%c0_24, %c0_25, %c0_26, %c0_27] : memref<1x4x8x8xbf16, #tpu.memory_space<vmem>>, vector<1x4x8x8xbf16>
    %45 = vector.shape_cast %44 : vector<1x4x8x8xbf16> to vector<4x8x8xbf16>
    %46 = vector.shape_cast %43 : vector<4x8x8xbf16> to vector<1x4x8x8xbf16>
    tpu.vector_store %arg9[%c0_24, %c0_25, %c0_26, %c0_27], %46 {strides = array<i32>} : memref<1x4x8x8xbf16, #tpu.memory_space<vmem>>, vector<1x4x8x8xbf16>,
    %47 = vector.shape_cast %34 : vector<8x32xf32> to vector<8x4x8xf32>
    %48 = tpu.transpose %47, [1, 0, 2] : vector<8x4x8xf32> -> vector<4x8x8xf32>
    %49 = arith.truncf %48 : vector<4x8x8xf32> to vector<4x8x8xbf16>
    %c0_28 = arith.constant 0 : index
    %c0_29 = arith.constant 0 : index
    %c0_30 = arith.constant 0 : index
    %c0_31 = arith.constant 0 : index
    %50 = vector.load %arg10[%c0_28, %c0_29, %c0_30, %c0_31] : memref<1x4x8x8xbf16, #tpu.memory_space<vmem>>, vector<1x4x8x8xbf16>
    %51 = vector.shape_cast %50 : vector<1x4x8x8xbf16> to vector<4x8x8xbf16>
    %52 = vector.shape_cast %49 : vector<4x8x8xbf16> to vector<1x4x8x8xbf16>
    tpu.vector_store %arg10[%c0_28, %c0_29, %c0_30, %c0_31], %52 {strides = array<i32>} : memref<1x4x8x8xbf16, #tpu.memory_space<vmem>>, vector<1x4x8x8xbf16>,
    return
  }
  func.func @transform_0(%arg0: i32, %arg1: i32) -> (i32, i32, i32) {
    %c0_i32 = arith.constant 0 : i32
    %c0_i32_0 = arith.constant 0 : i32
    return %arg0, %arg1, %c0_i32 : i32, i32, i32
  }
  func.func @transform_1(%arg0: i32, %arg1: i32) -> (i32, i32) {
    %c0_i32 = arith.constant 0 : i32
    %c0_i32_0 = arith.constant 0 : i32
    %c0_i32_1 = arith.constant 0 : i32
    return %c0_i32, %c0_i32_0 : i32, i32
  }
  func.func @transform_2(%arg0: i32, %arg1: i32) -> (i32, i32) {
    %c0_i32 = arith.constant 0 : i32
    %c0_i32_0 = arith.constant 0 : i32
    %c0_i32_1 = arith.constant 0 : i32
    return %c0_i32, %c0_i32_0 : i32, i32
  }
  func.func @transform_3(%arg0: i32, %arg1: i32) -> (i32, i32) {
    %c0_i32 = arith.constant 0 : i32
    %c0_i32_0 = arith.constant 0 : i32
    %c0_i32_1 = arith.constant 0 : i32
    return %c0_i32, %c0_i32_0 : i32, i32
  }
  func.func @transform_4(%arg0: i32, %arg1: i32) -> (i32, i32) {
    %c0_i32 = arith.constant 0 : i32
    %c0_i32_0 = arith.constant 0 : i32
    %c0_i32_1 = arith.constant 0 : i32
    return %c0_i32, %c0_i32_0 : i32, i32
  }
  func.func @transform_5(%arg0: i32, %arg1: i32) -> (i32, i32) {
    %c0_i32 = arith.constant 0 : i32
    %c0_i32_0 = arith.constant 0 : i32
    %c0_i32_1 = arith.constant 0 : i32
    return %c0_i32, %c0_i32_0 : i32, i32
  }
  func.func @transform_6(%arg0: i32, %arg1: i32) -> (i32, i32, i32, i32) {
    %c0_i32 = arith.constant 0 : i32
    %c0_i32_0 = arith.constant 0 : i32
    %c0_i32_1 = arith.constant 0 : i32
    return %arg0, %c0_i32, %arg1, %c0_i32_0 : i32, i32, i32, i32
  }
  func.func @transform_7(%arg0: i32, %arg1: i32) -> (i32, i32, i32, i32) {
    %c0_i32 = arith.constant 0 : i32
    %c0_i32_0 = arith.constant 0 : i32
    %c0_i32_1 = arith.constant 0 : i32
    return %arg0, %c0_i32, %arg1, %c0_i32_0 : i32, i32, i32, i32
  }
  func.func @transform_8(%arg0: i32, %arg1: i32) -> (i32, i32, i32, i32) {
    %c0_i32 = arith.constant 0 : i32
    %c0_i32_0 = arith.constant 0 : i32
    %c0_i32_1 = arith.constant 0 : i32
    return %arg0, %c0_i32, %arg1, %c0_i32_0 : i32, i32, i32, i32
  }
}

</mosaic_0001>

<bundles_post_ra>
// kernel: tpu_custom_call.1
= control target key start
LH: loop header
LB: loop body
LE: loop exit
PB: predicated region body
PF: predicated region fallthrough
CT: control target
= control target key end

     0   :  { %14 = vsyncpa [#allocation3], 0  ;;  %s2209_s0 = inlined_call_operand.hbm [shape: f32[2,8,32], index: 0, kind: input, shape index: {}]   ;;  %s2210_s1 = inlined_call_operand.vmem [shape: f32[1,32], index: 1, kind: input, shape index: {}]   ;;  %s2211_s2 = inlined_call_operand.vmem [shape: f32[1,32], index: 2, kind: input, shape index: {}]   ;;  %s2212_s3 = inlined_call_operand.hbm [shape: bf16[32,32], index: 3, kind: input, shape index: {}]   ;;  %s2213_s4 = inlined_call_operand.hbm [shape: bf16[32,32], index: 4, kind: input, shape index: {}]   ;;  %s2214_s5 = inlined_call_operand.vmem [shape: bf16[32,32], index: 5, kind: input, shape index: {}]   ;;  %s2215_s6 = inlined_call_operand.hbm [shape: bf16[2,4,8,8], index: 6, kind: output, shape index: {0}]   ;;  %s2216_s7 = inlined_call_operand.hbm [shape: bf16[2,4,8,8], index: 7, kind: output, shape index: {1}]   ;;  %s2217_s8 = inlined_call_operand.hbm [shape: bf16[2,4,8,8], index: 8, kind: output, shape index: {2}]  }
   0x1   :  { %16 = vsyncpa [#allocation3 + $0x1], 0 }
   0x2   :  { %17 = vsyncpa [#allocation6], 0 }
   0x3   :  { %18 = vsyncpa [#allocation4], 0 }
   0x4   :  { %20 = vsyncpa [#allocation4 + $0x1], 0 }
   0x5   :  { %21 = vsyncpa [#allocation10], 0 }
   0x6   :  { %23 = vsyncpa [#allocation10 + $0x1], 0  ;;  %s1772_s27 = smov 0   ;;  %s1774_s28 = smov 0  }
   0x7   :  { %s1776_s29 = smov 0   ;;  %s1778_s30 = smov 0  }
   0x8   :  { %s1780_s9 = smov 0   ;;  %s1782_s10 = smov 0  }
   0x9 LB: > { %2226 = sst [smem:[#allocation16_spill]] %s1688_s27  ;;  %s1803_s11 = sadd.s32 4294967295, %s1708_s10   ;;  %s1708_s10 = sphi %s1782_s10, %s29_s10   ;;  %s1704_s9 = sphi %s1780_s9, %s2250_s9   ;;  %s1700_s30 = sphi %s1778_s30, %s2249_s30   ;;  %s1696_s29 = sphi %s1776_s29, %s2248_s29   ;;  %s1692_s28 = sphi %s1774_s28, %s2247_s28   ;;  %s1688_s27 = sphi %s1772_s27, %s2246_s27  }
   0xa   : > { %s2219_s12 = sadd.s32 4294967294, %s1708_s10   ;;  %p63_p0 = scmp.ne.s32.totalorder %s1692_s28, %s1688_s27 }
   0xb   : > { %p2218_p1 = scmp.eq.s32.totalorder %s1803_s11, 0  ;;  %p200_p3 = scmp.eq.s32.totalorder %s2219_s12, 1 }
   0xc   : > { %p1287_p5 = scmp.ge.s32.totalorder %s1708_s10, 1  ;;  %p263_p7 = scmp.lt.s32.totalorder %s1708_s10, 3 }
   0xd   : > { %p1814_p4 = por %p2218_p1, %p63_p0  ;;  %p1819_p6 = por %p200_p3, %p63_p0 }
   0xe   : > { %p1824_p8 = pnand %p1287_p5, %p263_p7  ;;  %s1710_s16 = smov [#allocation5]  }
   0xf   : > { %s2227_s13 = scalar_select %p1814_p4, 1, 0 }
  0x10   : > { %s2228_s14 = scalar_select %p1819_p6, 1, 0 }
  0x11   : > { %s281_s17 = sshll.u32 %s1710_s16, 4  ;;  %p1380_p9 = pneg %p1824_p8  ;;  %s1828_s17 = int_to_ptr.vmem [resolvable:$true] %s281_s17 }
  0x12   : > { %2229 = sst [smem:[#allocation17_spill]] %s2228_s14  ;;  %s1711_s19 = smov [#allocation7]  }
  0x13   : > { %p1835_p11 = pnand %p1380_p9, %p2218_p1  ;;  %s294_s20 = sshll.u32 %s1711_s19, 4  ;;  %s1839_s20 = int_to_ptr.vmem [resolvable:$true] %s294_s20 }
  0x14   : > { %s1476_s23 = scalar_lea.hbm %s2212_s3, 256 }
  0x15   : > { %p1477_p12 = scmp.ne.s32.totalorder %s2212_s3, %s1476_s23  ;;  %p1478_p13 = pneg %p1835_p11 }
  0x16   : > { %p1483_p5 = scmp.lt.u32.totalorder %s1476_s23, %s2212_s3 }
  0x17   : > { %p1479_p0 = pnand %p1478_p13, %p1477_p12 }
  0x19   : > { %p1480_p3 = pneg %p1479_p0 }
  0x1b   : > { %p1485_p7 = pnand %p1483_p5, %p1480_p3 }
  0x1d   : > { %1488 = shalt.err (!%p1485_p7)
}
  0x1e   : > { %s1489_s19 = scalar_lea.vmem %s1828_s17, 256  ;;  %p1497_p2 = scmp.lt.s32.totalorder %s1828_s17, %s1828_s17 }
  0x1f   : > { %p1490_p9 = scmp.ne.s32.totalorder %s1828_s17, %s1489_s19  ;;  %p1498_p12 = scmp.lt.s32.totalorder %s1489_s19, %s1489_s19 }
  0x21   : > { %p1492_p10 = pnand %p1490_p9, %p1478_p13  ;;  %p1499_p0 = por %p1498_p12, %p1497_p2 }
  0x23   : > { %p1493_p1 = pneg %p1492_p10 }
  0x25   : > { %p1500_p6 = pnand %p1499_p0, %p1493_p1 }
  0x27   : > { %1503 = shalt.err (!%p1500_p6)
}
  0x28   : > { %s1712_s21 = smov 64   ;;  %s1713_s22 = smov 4  }
  0x29   : > { %1383 = dma.hbm_to_vmem [thread:$0]  (!%p1835_p11), %s2212_s3, 256, %s1828_s17, [#allocation6], %s1712_s21, %s1712_s21, %s1713_s22  }
  0x2a   : > { %s1504_s16 = scalar_lea.hbm %s2213_s4, 256 }
  0x2b   : > { %p1505_p2 = scmp.ne.s32.totalorder %s2213_s4, %s1504_s16  ;;  %p1511_p10 = scmp.lt.u32.totalorder %s1504_s16, %s2213_s4 }
  0x2d   : > { %p1507_p1 = pnand %p1505_p2, %p1478_p13 }
  0x2f   : > { %p1508_p6 = pneg %p1507_p1 }
  0x31   : > { %p1513_p3 = pnand %p1511_p10, %p1508_p6 }
  0x33   : > { %1516 = shalt.err (!%p1513_p3)
}
  0x34   : > { %s1517_s17 = scalar_lea.vmem %s1839_s20, 256  ;;  %p1525_p12 = scmp.lt.s32.totalorder %s1839_s20, %s1839_s20 }
  0x35   : > { %p1518_p5 = scmp.ne.s32.totalorder %s1839_s20, %s1517_s17  ;;  %p1526_p0 = scmp.lt.s32.totalorder %s1517_s17, %s1517_s17 }
  0x37   : > { %p1520_p7 = pnand %p1518_p5, %p1478_p13  ;;  %p1527_p2 = por %p1526_p0, %p1525_p12 }
  0x39   : > { %p1521_p9 = pneg %p1520_p7 }
  0x3b   : > { %p1528_p1 = pnand %p1527_p2, %p1521_p9 }
  0x3d   : > { %1531 = shalt.err (!%p1528_p1)
}
  0x3e   : > { %1386 = dma.hbm_to_vmem [thread:$0]  (!%p1835_p11), %s2213_s4, 256, %s1839_s20, [#allocation6], %s1712_s21, %s1712_s21, %s1713_s22  }
  0x3f   : > { %s41_s14 = sadd.s32 1, %s1704_s9  ;;  %s50_s23 = sadd.s32 1, %s1696_s29 }
  0x40   : > { %p43_p13 = scmp.ge.s32.totalorder %s41_s14, 2  ;;  %p57_p6 = scmp.ne.s32.totalorder %s1696_s29, %s1692_s28 }
  0x41   : > { %p58_p10 = scmp.eq.s32.totalorder %s1708_s10, 0  ;;  %p1403_p3 = scmp.lt.s32.totalorder %s1708_s10, 2 }
  0x42   : > { %s2252_s14 = smov (%p43_p13, %s41_s14), 0  ;;  %p2232_p7 = scmp.eq.s32.totalorder %s1803_s11, 1 }
  0x43   : > { %p59_p5 = por %p58_p10, %p57_p6  ;;  %s45_s24 = ssub.s32 %s1704_s9, %s2252_s14 }
  0x44   : > { %p1903_p9 = por %p2232_p7, %p57_p6  ;;  %s311_s25 = sand.u32 1, %s1696_s29  }
  0x45   : > { %p48_p12 = scmp.eq.s32.totalorder %s45_s24, 0  ;;  %s1291_s20 = sshll.u32 %s311_s25, 3 }
  0x46   : > { %s2233_s18 = scalar_select %p1903_p9, 1, 0 }
  0x47   : > { %s1292_s21 = sshll.u32 %s1704_s9, 7  ;;  %s315_s17 = scalar_lea.vmem [#allocation2], %s1291_s20 }
  0x48   : > { %s1912_s22 = scalar_select %p48_p12, %s1696_s29, %s50_s23  }
  0x49   : > { %s1917_s19 = scalar_lea.hbm %s2209_s0, %s1292_s21  ;;  %s323_s27 = sshll.u32 %s315_s17, 4  ;;  %s1925_s27 = int_to_ptr.vmem [resolvable:$true] %s323_s27 }
  0x4a   : > { %p1921_p11 = pnand %p1403_p3, %p59_p5  ;;  %s312_s23 = scalar_lea.sflag [#allocation3], %s311_s25 }
  0x4b   : > { %s1532_s24 = scalar_lea.hbm %s1917_s19, 128  ;;  %s1537_s26 = scalar_lea.hbm %s2209_s0, 256 }
  0x4c   : > { %p1533_p0 = scmp.ne.s32.totalorder %s1917_s19, %s1532_s24  ;;  %p1534_p2 = pneg %p1921_p11 }
  0x4d   : > { %p1538_p6 = scmp.lt.u32.totalorder %s1917_s19, %s2209_s0  ;;  %p1539_p10 = scmp.lt.u32.totalorder %s1537_s26, %s1532_s24 }
  0x4e   : > { %p1535_p1 = pnand %p1534_p2, %p1533_p0  ;;  %p1541_p5 = scmp.lt.u32.totalorder %s1532_s24, %s1917_s19 }
  0x4f   : > { %p1540_p3 = por %p1539_p10, %p1538_p6 }
  0x50   : > { %p1536_p13 = pneg %p1535_p1 }
  0x51   : > { %p1542_p7 = por %p1541_p5, %p1540_p3 }
  0x53   : > { %p1543_p12 = pnand %p1542_p7, %p1536_p13 }
  0x55   : > { %1546 = shalt.err (!%p1543_p12)
}
  0x56   : > { %s1547_s25 = scalar_lea.vmem %s1925_s27, 128  ;;  %s1714_s20 = smov [#allocation2]  }
  0x57   : > { %p1548_p0 = scmp.ne.s32.totalorder %s1925_s27, %s1547_s25  ;;  %s1552_s21 = sshll.u32 %s1714_s20, 4  ;;  %s1553_s21 = int_to_ptr.vmem [resolvable:$false] %s1552_s21 }
  0x58   : > { %s1554_s16 = scalar_lea.vmem %s1553_s21, 256  ;;  %p1555_p4 = scmp.lt.s32.totalorder %s1925_s27, %s1553_s21 }
  0x59   : > { %p1550_p1 = pnand %p1548_p0, %p1534_p2  ;;  %p1556_p6 = scmp.lt.s32.totalorder %s1554_s16, %s1547_s25 }
  0x5b   : > { %p1551_p9 = pneg %p1550_p1  ;;  %p1557_p10 = por %p1556_p6, %p1555_p4 }
  0x5d   : > { %p1558_p3 = pnand %p1557_p10, %p1551_p9 }
  0x5f   : > { %1561 = shalt.err (!%p1558_p3)
}
  0x60   : > { %1390 = dma.hbm_to_vmem [thread:$0]  (!%p1921_p11), %s1917_s19, 128, %s1925_s27, %s312_s23  }
  0x61   : > { %332 = sbr.rel (%p1824_p8) target bundleno = 842 (0x34a), region = 44  ;;  %s1955_s24 = sand.u32 (!%p1824_p8), 1, %s1692_s28  }
  0x62   : > { %s1294_s26 = sshll.u32 (!%p1824_p8), %s1955_s24, 3  ;;  %s335_s17 = scalar_lea.sflag (!%p1824_p8), [#allocation3], %s1955_s24 }
  0x63   : > { %s338_s25 = scalar_lea.vmem (!%p1824_p8), [#allocation2], %s1294_s26  ;;  %p2235_p4 = scmp.ne.s32.totalorder (!%p1824_p8), %s2227_s13, 0 }
  0x68   : > { %1671 = dma.done.wait (%p2235_p4), %s335_s17, 128  }
  0x69   : > { %1673 = vsyncadd (%p2235_p4), %s335_s17, 4294967168  ;;  %p2236_p9 = scmp.eq.s32.totalorder %s1803_s11, 0 }
  0x6b   : > { %1675 = dma.done.wait (%p2236_p9), [#allocation6], 512   ;;  %p2237_p11 = pmov %p2236_p9 }
  0x6c   : > { %vm393_vm0 = vcmask 261120   ;;  %v390_v0 = vld [vmem:[%s338_s25] sm:$0xff]  ;;  %v1468_v7 = vld [vmem:[#allocation5] sm:$0xff]   ;;  %v1715_v9 = vmov 0.0   ;;  %v1470_v10 = vld [vmem:[#allocation5 + $0x8] sm:$0xff]   ;;  %vm1716_vm1 = vmmov 0   ;;  %v610_v39 = vlaneseq }
  0x6d   : > { %1677 = vsyncadd (%p2237_p11), [#allocation6], 4294966784  ;;  %v394_v1 = vsel %vm393_vm0, %v390_v0, 0.0  ;;  %v1469_v8 = vld [vmem:[#allocation7] sm:$0xff]   ;;  %1340 = vmatprep.subr.bf16.mxu0 %v1715_v9  ;;  %1348 = vmatprep.subr.bf16.mxu1 %v1715_v9  ;;  %v1471_v11 = vld [vmem:[#allocation7 + $0x8] sm:$0xff]   ;;  %s1717_s16 = smov 104  }
  0x6e   : > { %395 = vadd.xlane.f32.xlu0 %v394_v1  ;;  %1341 = vmatpush3.bf16.msra.mxu0 %v1468_v7  ;;  %v1300_v16 = vld [vmem:[%s2210_s1] ss:$0 sm:$0xff]  ;;  %v1473_v23 = vld [vmem:[%s2214_s5 + $0x8] sm:$0xff]   ;;  %s1718_s26 = smov 120   ;;  %s1719_s17 = smov 112   ;;  %v611_v43 = vshrl.u32 %v610_v39, 7 }
  0x6f   : > { %1349 = vmatpush3.bf16.msra.mxu1 %v1469_v8  ;;  %1342 = vmatprep.subr.bf16.mxu0 %v1715_v9  ;;  %v1301_v18 = vld [vmem:[%s2211_s2] ss:$0 sm:$0xff]  ;;  %v1720_v37 = vmov 1983009808   ;;  %v1721_v40 = vmov 1934713408  }
  0x70   : > { %1350 = vmatprep.subr.bf16.mxu1 %v1715_v9  ;;  %1344 = vmatprep.mubr.msk.bf16.mxu0 %vm1716_vm1, %v1715_v9  ;;  %v1472_v21 = vld [vmem:[%s2214_s5] sm:$0xff]   ;;  %v608_v38 = vunpack.c.l.s4 %v1720_v37  ;;  %v640_v41 = vunpack.c.l.s4 %v1721_v40  ;;  %s2016_s25 = sshll.u32 %s1955_s24, 4  ;;  %vm745_vm2 = vcmask 60416   ;;  %s1063_s13 = sand.u32 1, %s1803_s11  }
  0x71   : > { %1352 = vmatprep.mubr.msk.bf16.mxu1 %vm1716_vm1, %v1715_v9  ;;  %s2030_s15 = sshll.u32 %s1700_s30, 8  ;;  %s381_s19 = scalar_lea.vmem [#allocation9], %s2016_s25 }
  0x72   : > { %1343 = vmatpush3.bf16.msra.mxu0 %v1470_v10  ;;  %v609_v42 = vunpack.c.0.s8 %v608_v38  ;;  %v641_v46 = vunpack.c.0.s8 %v640_v41  ;;  %s1100_s27 = sshll.u32 %s381_s19, 4  ;;  %s2037_s30 = scalar_lea.hbm %s2216_s7, %s2030_s15  ;;  %s2039_s27 = int_to_ptr.vmem [resolvable:$true] %s1100_s27 }
  0x73   : > { %1351 = vmatpush3.bf16.msra.mxu1 %v1471_v11  ;;  %1356 = vmatprep.subr.bf16.mxu0 %v1715_v9  ;;  %s2051_s20 = scalar_lea.sflag [#allocation10], %s1063_s13  ;;  %s1562_s21 = scalar_lea.vmem %s2039_s27, 256 }
  0x74   : > { %v1997_v47 = vsub.s32 %v609_v42, %v611_v43  ;;  %v1999_v53 = vsub.s32 %v641_v46, %v611_v43  ;;  %p1563_p8 = scmp.ne.s32.totalorder %s2039_s27, %s1562_s21  ;;  %p2238_p2 = scmp.ne.s32.totalorder %s2233_s18, 0 }
  0x76   : > { %p1564_p13 = pnand %p1563_p8, %p2238_p2 }
  0x78   : > { %p1565_p5 = pneg %p1564_p13 }
  0xfb   : > { %v396_v2 = vpop.xlane.xlu0 %395 }
  0xfc   : > { %v398_v3 = vmul.f32 0.03125, %v396_v2 }
  0xfe   : > { %v399_v4 = vsub.f32 %v390_v0, %v398_v3 }
 0x100   : > { %v400_v5 = vmul.f32 %v399_v4, %v399_v4 }
 0x102   : > { %v401_v6 = vsel %vm393_vm0, %v400_v5, 0.0 }
 0x103   : > { %402 = vadd.xlane.f32.xlu0 %v401_v6 }
 0x190   : > { %v403_v12 = vpop.xlane.xlu0 %402 }
 0x191   : > { %v404_v13 = vmul.f32 0.03125, %v403_v12 }
 0x193   : > { %v405_v14 = vadd.f32 1e-05, %v404_v13 }
 0x195   : > { %1474 = vrsqrt.f32 %v405_v14 }
 0x19f   : > { %v1475_v15 = vpop.eup %1474 }
 0x1a0   : > { %v407_v17 = vmul.f32 %v1475_v15, %v399_v4 }
 0x1a2   : > { %v414_v19 = vmul.f32 %v1300_v16, %v407_v17 }
 0x1a4   : > { %v421_v20 = vadd.f32 %v1301_v18, %v414_v19 }
 0x1a6   : > { %v422_v22 = vpack.c.bf16 %v421_v20, %v421_v20 }
 0x1a8   : > { %1345 = vmatmul.mubr.msk.bf16.vlgmr.msra.gmra.mrb[0].mxu0 %vm393_vm0, %v422_v22  ;;  %1353 = vmatmul.mubr.msk.bf16.vlgmr.msra.gmra.mrb[0].mxu1 %vm393_vm0, %v422_v22 }
 0x1a9   : > { %1357 = vmatpush3.bf16.msra.mxu0 %v1472_v21  ;;  %1360 = vmatprep.mubr.msk.bf16.mxu0 %vm1716_vm1, %v1715_v9 }
 0x1aa   : > { %1358 = vmatprep.subr.bf16.mxu0 %v1715_v9 }
 0x1ad   : > { %1359 = vmatpush3.bf16.msra.mxu0 %v1473_v23 }
 0x1b0   : > { %1361 = vmatmul.mubr.msk.bf16.vlgmr.msra.gmra.mrb[4].mxu0 %vm393_vm0, %v422_v22 }
 0x27b   : > { %v476_v24 = vpop.f32.mrb[0].mxu0  ;;  %v533_v25 = vpop.f32.mrb[0].mxu1 }
 0x27c   : > { %757 = vrot.lane.b32.xlu0 %v533_v25, %s1717_s16  ;;  %751 = vrot.lane.b32.xlu1 %v533_v25, %s1718_s26  ;;  %v1346_v26 = vpop.f32.mrb[1].mxu0  ;;  %v1354_v27 = vpop.f32.mrb[1].mxu1  ;;  %v1987_v32 = vmul.f32 0.35355338, %v476_v24 }
 0x27d   : > { %v479_v28 = vpop.f32.mrb[2].mxu0  ;;  %v536_v29 = vpop.f32.mrb[2].mxu1 }
 0x27e   : > { %v1347_v30 = vpop.f32.mrb[3].mxu0  ;;  %v1355_v31 = vpop.f32.mrb[3].mxu1 }
 0x280   : > { %754 = vrot.lane.b32.xlu1 %v533_v25, %s1719_s17 }
 0x283   : > { %v1989_v33 = vpop.f32.mrb[4].mxu0 }
 0x284   : > { %596 = vrot.lane.b32.xlu1 %v1987_v32, %s1718_s26  ;;  %v1362_v34 = vpop.f32.mrb[5].mxu0 }
 0x285   : > { %v592_v35 = vpop.f32.mrb[6].mxu0 }
 0x286   : > { %v1363_v36 = vpop.f32.mrb[7].mxu0 }
 0x288   : > { %599 = vrot.lane.b32.xlu1 %v1987_v32, %s1719_s17 }
 0x28c   : > { %602 = vrot.lane.b32.xlu1 %v1987_v32, %s1717_s16 }
 0x290   : > { %905 = vrot.lane.b32.xlu1 %v1989_v33, %s1718_s26 }
 0x294   : > { %908 = vrot.lane.b32.xlu1 %v1989_v33, %s1719_s17 }
 0x298   : > { %911 = vrot.lane.b32.xlu1 %v1989_v33, %s1717_s16  ;;  %s1722_s16 = smov [#allocation9]  }
 0x299   : > { %s1566_s26 = sshll.u32 %s1722_s16, 4  ;;  %s1567_s26 = int_to_ptr.vmem [resolvable:$false] %s1566_s26 }
 0x29a   : > { %s1568_s17 = scalar_lea.vmem %s1567_s26, 512  ;;  %p1569_p7 = scmp.lt.s32.totalorder %s2039_s27, %s1567_s26 }
 0x29b   : > { %p1570_p12 = scmp.lt.s32.totalorder %s1568_s17, %s1562_s21 }
 0x29d   : > { %p1571_p0 = por %p1570_p12, %p1569_p7 }
 0x29f   : > { %p1572_p1 = pnand %p1571_p0, %p1565_p5 }
 0x2ee   : > { %v758_v44 = vpop.permute.xlu0 %757  ;;  %v752_v45 = vpop.permute.xlu1 %751 }
 0x2ef   : > { %v776_v48 = vcombine.low %v752_v45, %v758_v44  ;;  %v777_v49 = vcombine.high %v752_v45, %v758_v44 }
 0x2f1   : > { %v784_v54 = vrot.slane %v776_v48, %v1997_v47  ;;  %v791_v55 = vrot.slane %v777_v49, %v1997_v47 }
 0x2f2   : > { %v755_v50 = vpop.permute.xlu1 %754 }
 0x2f3   : > { %v760_v51 = vcombine.low %v533_v25, %v755_v50  ;;  %v761_v52 = vcombine.high %v533_v25, %v755_v50 }
 0x2f5   : > { %v768_v56 = vrot.slane %v760_v51, %v1997_v47  ;;  %v775_v57 = vrot.slane %v761_v52, %v1997_v47 }
 0x2f6   : > { %v597_v58 = vpop.permute.xlu1 %596 }
 0x2f7   : > { %v792_v59 = vcombine.low %v768_v56, %v784_v54  ;;  %v793_v60 = vcombine.high %v768_v56, %v784_v54  ;;  %v808_v61 = vcombine.low %v775_v57, %v791_v55  ;;  %v809_v62 = vcombine.high %v775_v57, %v791_v55 }
 0x2f9   : > { %v800_v63 = vrot.slane %v792_v59, %v1999_v53  ;;  %v807_v0 = vrot.slane %v793_v60, %v1999_v53  ;;  %v816_v1 = vrot.slane %v808_v61, %v1999_v53  ;;  %v823_v2 = vrot.slane %v809_v62, %v1999_v53 }
 0x2fa   : > { %v600_v3 = vpop.permute.xlu1 %599 }
 0x2fb   : > { %v828_v4 = vcombine.low %v800_v63, %v807_v0  ;;  %v1313_v5 = vcombine.high %v800_v63, %v807_v0  ;;  %v844_v6 = vcombine.low %v816_v1, %v823_v2  ;;  %v1314_v7 = vcombine.high %v816_v1, %v823_v2 }
 0x2fc   : > { %v605_v12 = vcombine.low %v1987_v32, %v600_v3  ;;  %v606_v13 = vcombine.high %v1987_v32, %v600_v3 }
 0x2fd   : > { %v835_v8 = vrot.slane %v828_v4, %v1997_v47  ;;  %v843_v9 = vrot.slane %v1313_v5, %v1997_v47  ;;  %v851_v10 = vrot.slane %v844_v6, %v1997_v47  ;;  %v859_v11 = vrot.slane %v1314_v7, %v1997_v47 }
 0x2fe   : > { %v603_v14 = vpop.permute.xlu1 %602  ;;  %v613_v25 = vrot.slane %v605_v12, %v1997_v47  ;;  %v620_v26 = vrot.slane %v606_v13, %v1997_v47 }
 0x2ff   : > { %v860_v15 = vcombine.low %v835_v8, %v843_v9  ;;  %v861_v16 = vcombine.high %v835_v8, %v843_v9  ;;  %v876_v17 = vcombine.low %v851_v10, %v859_v11  ;;  %v877_v18 = vcombine.high %v851_v10, %v859_v11 }
 0x300   : > { %v621_v19 = vcombine.low %v597_v58, %v603_v14  ;;  %v622_v20 = vcombine.high %v597_v58, %v603_v14 }
 0x301   : > { %v868_v21 = vrot.slane %v860_v15, %v1999_v53  ;;  %v875_v22 = vrot.slane %v861_v16, %v1999_v53  ;;  %v884_v23 = vrot.slane %v876_v17, %v1999_v53  ;;  %v891_v24 = vrot.slane %v877_v18, %v1999_v53 }
 0x302   : > { %v629_v27 = vrot.slane %v621_v19, %v1997_v47  ;;  %v636_v28 = vrot.slane %v622_v20, %v1997_v47  ;;  %v2027_v29 = vpop.permute.xlu1 %905 }
 0x303   : > { %v892_v30 = vcombine.low %v868_v21, %v884_v23  ;;  %v893_v31 = vcombine.high %v868_v21, %v884_v23  ;;  %v894_v32 = vcombine.low %v875_v22, %v891_v24  ;;  %v895_v34 = vcombine.high %v875_v22, %v891_v24 }
 0x304   : > { %v637_v35 = vcombine.low %v613_v25, %v629_v27  ;;  %v638_v36 = vcombine.high %v613_v25, %v629_v27  ;;  %v653_v37 = vcombine.low %v620_v26, %v636_v28  ;;  %v654_v38 = vcombine.high %v620_v26, %v636_v28 }
 0x305   : > { %v896_v39 = vpack.c.bf16 %v892_v30, %v892_v30  ;;  %v897_v40 = vpack.c.bf16 %v893_v31, %v893_v31  ;;  %v898_v41 = vpack.c.bf16 %v894_v32, %v894_v32  ;;  %v899_v42 = vpack.c.bf16 %v895_v34, %v895_v34 }
 0x306   : > { %v645_v43 = vrot.slane %v637_v35, %v1999_v53  ;;  %v652_v44 = vrot.slane %v638_v36, %v1999_v53  ;;  %v661_v45 = vrot.slane %v653_v37, %v1999_v53  ;;  %v668_v46 = vrot.slane %v654_v38, %v1999_v53  ;;  %v909_v48 = vpop.permute.xlu1 %908 }
 0x307   : > { %900 = vst.msk [vmem:[%s381_s19] sm:$0xf] %vm745_vm2, %v896_v39  ;;  %901 = vst.msk [vmem:[%s381_s19 + $0x4] sm:$0xf] %vm745_vm2, %v897_v40 }
 0x308   : > { %902 = vst.msk [vmem:[%s381_s19 + $0x8] sm:$0xf] %vm745_vm2, %v898_v41  ;;  %903 = vst.msk [vmem:[%s381_s19 + $0xc] sm:$0xf] %vm745_vm2, %v899_v42  ;;  %v673_v49 = vcombine.low %v645_v43, %v652_v44  ;;  %v1311_v50 = vcombine.high %v645_v43, %v652_v44  ;;  %v689_v51 = vcombine.low %v661_v45, %v668_v46 }
 0x309   : > { %v1312_v52 = vcombine.high %v661_v45, %v668_v46 }
 0x30a   : > { %1575 = shalt.err (!%p1572_p1)
}
 0x30b   : > { %s1576_s11 = scalar_lea.hbm %s2037_s30, 256  ;;  %s1580_s12 = scalar_lea.hbm %s2216_s7, 512 }
 0x30c   : > { %p1577_p6 = scmp.ne.s32.totalorder %s2037_s30, %s1576_s11  ;;  %p1581_p4 = scmp.lt.u32.totalorder %s2037_s30, %s2216_s7 }
 0x30d   : > { %p1582_p9 = scmp.lt.u32.totalorder %s1580_s12, %s1576_s11  ;;  %p1584_p8 = scmp.lt.u32.totalorder %s1576_s11, %s2037_s30 }
 0x30e   : > { %p1578_p10 = pnand %p1577_p6, %p2238_p2 }
 0x30f   : > { %p1583_p11 = por %p1582_p9, %p1581_p4 }
 0x310   : > { %p1579_p3 = pneg %p1578_p10 }
 0x311   : > { %p1585_p13 = por %p1584_p8, %p1583_p11 }
 0x313   : > { %p1586_p5 = pnand %p1585_p13, %p1579_p3 }
 0x315   : > { %1589 = shalt.err (!%p1586_p5)
}
 0x316   : > { %s2224_s21 = smov 64   ;;  %s1724_s26 = smov 4   ;;  %v914_v54 = vcombine.low %v1989_v33, %v909_v48  ;;  %v915_v55 = vcombine.high %v1989_v33, %v909_v48  ;;  %v680_v56 = vrot.slane %v673_v49, %v1997_v47  ;;  %v688_v57 = vrot.slane %v1311_v50, %v1997_v47  ;;  %v912_v60 = vpop.permute.xlu1 %911 }
 0x317   : > { %1375 = dma.vmem_to_hbm [thread:$0]  (%p2238_p2), %s2039_s27, 256, %s2037_s30, %s2051_s20, %s2224_s21, %s2224_s21, %s1724_s26   ;;  %v696_v58 = vrot.slane %v689_v51, %v1997_v47  ;;  %v704_v59 = vrot.slane %v1312_v52, %v1997_v47  ;;  %v930_v61 = vcombine.low %v2027_v29, %v912_v60  ;;  %v931_v62 = vcombine.high %v2027_v29, %v912_v60 }
 0x318   : > { %v705_v63 = vcombine.low %v680_v56, %v688_v57  ;;  %v706_v0 = vcombine.high %v680_v56, %v688_v57  ;;  %v922_v33 = vrot.slane %v914_v54, %v1997_v47  ;;  %v929_v3 = vrot.slane %v915_v55, %v1997_v47  ;;  %s374_s27 = scalar_lea.vmem [#allocation8], %s2016_s25  ;;  %s2103_s13 = scalar_lea.hbm %s2215_s6, %s2030_s15 }
 0x319   : > { %v721_v1 = vcombine.low %v696_v58, %v704_v59  ;;  %v722_v2 = vcombine.high %v696_v58, %v704_v59  ;;  %v938_v4 = vrot.slane %v930_v61, %v1997_v47  ;;  %v945_v5 = vrot.slane %v931_v62, %v1997_v47  ;;  %s1083_s30 = sshll.u32 %s374_s27, 4  ;;  %s1725_s23 = smov [#allocation8]   ;;  %s2105_s30 = int_to_ptr.vmem [resolvable:$true] %s1083_s30 }
 0x31a   : > { %v713_v6 = vrot.slane %v705_v63, %v1999_v53  ;;  %v720_v7 = vrot.slane %v706_v0, %v1999_v53  ;;  %s1590_s12 = scalar_lea.vmem %s2105_s30, 256  ;;  %s1594_s16 = sshll.u32 %s1725_s23, 4  ;;  %s1595_s16 = int_to_ptr.vmem [resolvable:$false] %s1594_s16 }
 0x31b   : > { %v729_v8 = vrot.slane %v721_v1, %v1999_v53  ;;  %v736_v9 = vrot.slane %v722_v2, %v1999_v53  ;;  %v946_v10 = vcombine.low %v922_v33, %v938_v4  ;;  %v947_v11 = vcombine.high %v922_v33, %v938_v4  ;;  %p1591_p7 = scmp.ne.s32.totalorder %s2105_s30, %s1590_s12  ;;  %s1596_s17 = scalar_lea.vmem %s1595_s16, 512 }
 0x31c   : > { %v962_v12 = vcombine.low %v929_v3, %v945_v5  ;;  %v963_v13 = vcombine.high %v929_v3, %v945_v5  ;;  %p1597_p1 = scmp.lt.s32.totalorder %s2105_s30, %s1595_s16  ;;  %p1598_p6 = scmp.lt.s32.totalorder %s1596_s17, %s1590_s12 }
 0x31d   : > { %v737_v14 = vcombine.low %v713_v6, %v729_v8  ;;  %v738_v15 = vcombine.high %v713_v6, %v729_v8  ;;  %v739_v16 = vcombine.low %v720_v7, %v736_v9  ;;  %v740_v17 = vcombine.high %v720_v7, %v736_v9  ;;  %p1592_p12 = pnand %p1591_p7, %p2238_p2 }
 0x31e   : > { %v954_v18 = vrot.slane %v946_v10, %v1999_v53  ;;  %v961_v19 = vrot.slane %v947_v11, %v1999_v53  ;;  %v970_v20 = vrot.slane %v962_v12, %v1999_v53  ;;  %v977_v21 = vrot.slane %v963_v13, %v1999_v53  ;;  %p1599_p10 = por %p1598_p6, %p1597_p1 }
 0x31f   : > { %v741_v22 = vpack.c.bf16 %v737_v14, %v737_v14  ;;  %v742_v23 = vpack.c.bf16 %v738_v15, %v738_v15  ;;  %v743_v24 = vpack.c.bf16 %v739_v16, %v739_v16  ;;  %v744_v25 = vpack.c.bf16 %v740_v17, %v740_v17  ;;  %p1593_p0 = pneg %p1592_p12 }
 0x320   : > { %v982_v26 = vcombine.low %v954_v18, %v961_v19  ;;  %v1315_v27 = vcombine.high %v954_v18, %v961_v19  ;;  %v998_v28 = vcombine.low %v970_v20, %v977_v21  ;;  %v1316_v29 = vcombine.high %v970_v20, %v977_v21 }
 0x321   : > { %746 = vst.msk [vmem:[%s374_s27] sm:$0xf] %vm745_vm2, %v741_v22  ;;  %747 = vst.msk [vmem:[%s374_s27 + $0x4] sm:$0xf] %vm745_vm2, %v742_v23  ;;  %p1600_p3 = pnand %p1599_p10, %p1593_p0 }
 0x322   : > { %748 = vst.msk [vmem:[%s374_s27 + $0x8] sm:$0xf] %vm745_vm2, %v743_v24  ;;  %749 = vst.msk [vmem:[%s374_s27 + $0xc] sm:$0xf] %vm745_vm2, %v744_v25  ;;  %v989_v30 = vrot.slane %v982_v26, %v1997_v47  ;;  %v997_v31 = vrot.slane %v1315_v27, %v1997_v47  ;;  %v1005_v32 = vrot.slane %v998_v28, %v1997_v47 }
 0x323   : > { %v1013_v34 = vrot.slane %v1316_v29, %v1997_v47 }
 0x324   : > { %1603 = shalt.err (!%p1600_p3)
}
 0x325   : > { %s1604_s27 = scalar_lea.hbm %s2103_s13, 256  ;;  %s1608_s23 = scalar_lea.hbm %s2215_s6, 512 }
 0x326   : > { %p1605_p4 = scmp.ne.s32.totalorder %s2103_s13, %s1604_s27  ;;  %p1609_p8 = scmp.lt.u32.totalorder %s2103_s13, %s2215_s6 }
 0x327   : > { %p1610_p13 = scmp.lt.u32.totalorder %s1608_s23, %s1604_s27  ;;  %p1612_p7 = scmp.lt.u32.totalorder %s1604_s27, %s2103_s13 }
 0x328   : > { %p1606_p9 = pnand %p1605_p4, %p2238_p2 }
 0x329   : > { %p1611_p5 = por %p1610_p13, %p1609_p8 }
 0x32a   : > { %p1607_p11 = pneg %p1606_p9 }
 0x32b   : > { %p1613_p12 = por %p1612_p7, %p1611_p5 }
 0x32d   : > { %p1614_p0 = pnand %p1613_p12, %p1607_p11 }
 0x32f   : > { %1617 = shalt.err (!%p1614_p0)
}
 0x330   : > { %s2239_s12 = smov 64   ;;  %s2240_s17 = scalar_lea.sflag [#allocation4], %s1955_s24  ;;  %v1014_v47 = vcombine.low %v989_v30, %v997_v31  ;;  %v1015_v35 = vcombine.high %v989_v30, %v997_v31  ;;  %v1030_v36 = vcombine.low %v1005_v32, %v1013_v34  ;;  %v1031_v37 = vcombine.high %v1005_v32, %v1013_v34 }
 0x331   : > { %1374 = dma.vmem_to_hbm [thread:$0]  (%p2238_p2), %s2105_s30, 256, %s2103_s13, %s2240_s17, %s2239_s12, %s2239_s12, %s1724_s26  }
 0x332   : > { %v1022_v38 = vrot.slane %v1014_v47, %v1999_v53  ;;  %v1029_v39 = vrot.slane %v1015_v35, %v1999_v53  ;;  %v1038_v40 = vrot.slane %v1030_v36, %v1999_v53  ;;  %v1045_v41 = vrot.slane %v1031_v37, %v1999_v53  ;;  %s388_s21 = scalar_lea.vmem [#allocation11], %s2016_s25  ;;  %s2151_s13 = scalar_lea.hbm %s2217_s8, %s2030_s15 }
 0x333   : > { %s1117_s19 = sshll.u32 %s388_s21, 4  ;;  %s1726_s15 = smov [#allocation11]   ;;  %s2153_s19 = int_to_ptr.vmem [resolvable:$true] %s1117_s19 }
 0x334   : > { %v1046_v42 = vcombine.low %v1022_v38, %v1038_v40  ;;  %v1047_v43 = vcombine.high %v1022_v38, %v1038_v40  ;;  %v1048_v44 = vcombine.low %v1029_v39, %v1045_v41  ;;  %v1049_v45 = vcombine.high %v1029_v39, %v1045_v41  ;;  %s1618_s25 = scalar_lea.vmem %s2153_s19, 256  ;;  %s1622_s27 = sshll.u32 %s1726_s15, 4  ;;  %s1623_s27 = int_to_ptr.vmem [resolvable:$false] %s1622_s27 }
 0x335   : > { %p1619_p1 = scmp.ne.s32.totalorder %s2153_s19, %s1618_s25  ;;  %s1624_s11 = scalar_lea.vmem %s1623_s27, 512 }
 0x336   : > { %v1050_v46 = vpack.c.bf16 %v1046_v42, %v1046_v42  ;;  %v1051_v48 = vpack.c.bf16 %v1047_v43, %v1047_v43  ;;  %v1052_v49 = vpack.c.bf16 %v1048_v44, %v1048_v44  ;;  %v1053_v50 = vpack.c.bf16 %v1049_v45, %v1049_v45  ;;  %p1625_p3 = scmp.lt.s32.totalorder %s2153_s19, %s1623_s27  ;;  %p1626_p4 = scmp.lt.s32.totalorder %s1624_s11, %s1618_s25 }
 0x337   : > { %p1620_p6 = pnand %p1619_p1, %p2238_p2 }
 0x338   : > { %1054 = vst.msk [vmem:[%s388_s21] sm:$0xf] %vm745_vm2, %v1050_v46  ;;  %1055 = vst.msk [vmem:[%s388_s21 + $0x4] sm:$0xf] %vm745_vm2, %v1051_v48  ;;  %p1627_p9 = por %p1626_p4, %p1625_p3 }
 0x339   : > { %1056 = vst.msk [vmem:[%s388_s21 + $0x8] sm:$0xf] %vm745_vm2, %v1052_v49  ;;  %1057 = vst.msk [vmem:[%s388_s21 + $0xc] sm:$0xf] %vm745_vm2, %v1053_v50  ;;  %p1621_p10 = pneg %p1620_p6 }
 0x33b   : > { %p1628_p11 = pnand %p1627_p9, %p1621_p10 }
 0x33d   : > { %1631 = shalt.err (!%p1628_p11)
}
 0x33e   : > { %s1632_s23 = scalar_lea.hbm %s2151_s13, 256  ;;  %s1636_s21 = scalar_lea.hbm %s2217_s8, 512 }
 0x33f   : > { %p1633_p8 = scmp.ne.s32.totalorder %s2151_s13, %s1632_s23  ;;  %p1637_p7 = scmp.lt.u32.totalorder %s2151_s13, %s2217_s8 }
 0x340   : > { %p1638_p12 = scmp.lt.u32.totalorder %s1636_s21, %s1632_s23  ;;  %p1640_p1 = scmp.lt.u32.totalorder %s1632_s23, %s2151_s13 }
 0x341   : > { %p1634_p13 = pnand %p1633_p8, %p2238_p2 }
 0x342   : > { %p1639_p0 = por %p1638_p12, %p1637_p7 }
 0x343   : > { %p1635_p5 = pneg %p1634_p13 }
 0x344   : > { %p1641_p6 = por %p1640_p1, %p1639_p0 }
 0x346   : > { %p1642_p10 = pnand %p1641_p6, %p1635_p5 }
 0x348   : > { %1645 = shalt.err (!%p1642_p10)
}
 0x349   : > { %1376 = dma.vmem_to_hbm [thread:$0]  (%p2238_p2), %s2153_s19, 256, %s2151_s13, %s2051_s20, %s2239_s12, %s2239_s12, %s1724_s26  }
 0x34a PF: > { %s2241_s25 = sld [smem:[#allocation16_spill]]  ;;  %s2242_s15 = sld [smem:[#allocation17_spill]] }
 0x34b   : > { %p2244_p4 = scmp.ge.s32.totalorder %s1708_s10, 2 }
 0x350   : > { %s1132_s27 = sand.u32 1, %s2241_s25   ;;  %p2243_p3 = scmp.ne.s32.totalorder %s2242_s15, 0 }
 0x351   : > { %s1133_s11 = scalar_lea.sflag [#allocation4], %s1132_s27 }
 0x352   : > { %p1392_p9 = pnand %p2244_p4, %p2243_p3 }
 0x354   : > { %1679 = dma.done.wait (!%p1392_p9), %s1133_s11, 256  }
 0x355   : > { %1681 = vsyncadd (!%p1392_p9), %s1133_s11, 4294967040  ;;  %s2245_s18 = sadd.s32 4294967294, %s1708_s10  }
 0x356   : > { %s1141_s23 = sand.u32 1, %s2245_s18  }
 0x357   : > { %s1142_s16 = scalar_lea.sflag [#allocation10], %s1141_s23 }
 0x358   : > { %1683 = dma.done.wait (!%p1392_p9), %s1142_s16, 512  }
 0x359   : > { %1685 = vsyncadd (!%p1392_p9), %s1142_s16, 4294966784  ;;  %s29_s10 = sadd.s32 1, %s1708_s10   ;;  %s2246_s27 = smov %s1692_s28 }
 0x35a   : > { %p26_p2 = scmp.ge.s32.totalorder %s29_s10, 4   ;;  %s2247_s28 = smov %s1696_s29 }
 0x35b   : > { %s2248_s29 = smov %s1912_s22  ;;  %s2249_s30 = smov %s1704_s9 }
 0x35c   : > { %s2250_s9 = smov %s2252_s14  ;;  %28 = sbr.rel (!%p26_p2) target bundleno = 9 (0x9), region = 129 }
 0x363   :  { %1156 = vsyncpa [#allocation3], 1 }
 0x364   :  { %1158 = vsyncpa [#allocation3 + $0x1], 1 }
 0x365   :  { %1159 = vsyncpa [#allocation6], 1 }
 0x366   :  { %1160 = vsyncpa [#allocation4], 1 }
 0x367   :  { %1162 = vsyncpa [#allocation4 + $0x1], 1 }
 0x368   :  { %1163 = vsyncpa [#allocation10], 1 }
 0x369   :  { %1165 = vsyncpa [#allocation10 + $0x1], 1 }

</bundles_post_ra>
